<compile_context>
chip_gen: v5e
topology: v5e:2x2
jax: 0.10.0
libtpu: 0.0.40
codegen_flags: <defaults>
</compile_context>

<pallas_src>
import functools

import jax
import jax.numpy as jnp
from jax.experimental import pallas as pl
from jax.experimental.pallas import tpu as pltpu


def _elu(x, alpha):
    # PyTorch nn.ELU(alpha): x if x > 0 else alpha * (exp(x) - 1).
    # exp(x) - 1 (not expm1) keeps the transcendental a single EUP op.
    return jnp.where(x > 0, x, alpha * (jnp.exp(x) - 1.0))


def _bf16_activations_ok():
    # bf16 VPU/EUP exist on v6e/v7x; keep f32 activations on v5e and older (and on failure).
    try:
        kind = jax.devices()[0].device_kind.lower()
        return ("v6" in kind) or ("v7" in kind)
    except Exception:
        return False


# --------------------------------------------------------------------------- kernel
def _mlp_kernel(x_ref, w1_ref, b1_ref, w2_ref, b2_ref, w3_ref, b3_ref, out_ref,
                *, act_dtype):
    """One row tile of: [x | lab]·W1+b1 -> ELU(.2) -> ·W2+b2 -> ELU(.2) -> ·W3+b3."""
    x = x_ref[...].astype(jnp.bfloat16)          # f32 in HBM, cast in-kernel (free VPU op)

    # Layer 1: label column is already part of x's K dimension (single matmul, K tiny).
    h1 = jnp.dot(x, w1_ref[...], preferred_element_type=jnp.float32) + b1_ref[...]
    h1 = _elu(h1.astype(act_dtype), 0.2)

    # Layer 2
    h2 = jnp.dot(h1.astype(jnp.bfloat16), w2_ref[...],
                 preferred_element_type=jnp.float32) + b2_ref[...]
    h2 = _elu(h2.astype(act_dtype), 0.2)

    # Layer 3
    out = jnp.dot(h2.astype(jnp.bfloat16), w3_ref[...],
                  preferred_element_type=jnp.float32) + b3_ref[...]
    out_ref[...] = out.astype(out_ref.dtype)


def _choose_row_tile(n_rows, feat, hidden, d_out, out_bytes):
    """Largest row tile that (a) leaves >=2 grid steps (v7x megacore) and (b) fits VMEM."""
    if n_rows < 128:
        return n_rows                            # one full-dim tile (legal: equals array dim)
    # Crude per-row VMEM estimate: double-buffered in/out + a few live f32 intermediates.
    per_row = 2 * feat * 4 + 2 * d_out * out_bytes + 4 * hidden * 4
    budget = 12 << 20                            # stay under v5e's 16 MiB scoped-VMEM default
    tile = 128
    for t in (256, 512, 1024, 2048, 4096):
        if n_rows >= 2 * t and t * per_row <= budget:
            tile = t
    return tile


def mlp_pallas(x, w1, b1, w2, b2, w3, b3, *, out_dtype=jnp.float32):
    """x: (N, feat) f32 (label column already concatenated); weights (in, out); biases (1, out)."""
    n, feat = x.shape
    hidden = w1.shape[1]
    d_out = w3.shape[1]

    row_tile = _choose_row_tile(n, feat, hidden, d_out, jnp.dtype(out_dtype).itemsize)
    grid = (pl.cdiv(n, row_tile),)               # no pad/slice: Pallas masks the edge tile

    act_dtype = jnp.bfloat16 if _bf16_activations_ok() else jnp.float32
    kernel = functools.partial(_mlp_kernel, act_dtype=act_dtype)

    full = lambda i: (0, 0)                      # weights/biases: same resident block each step
    return pl.pallas_call(
        kernel,
        out_shape=jax.ShapeDtypeStruct((n, d_out), out_dtype),
        grid=grid,
        in_specs=[
            pl.BlockSpec((row_tile, feat), lambda i: (i, 0)),   # rows streamed per tile
            pl.BlockSpec((feat, hidden), full),
            pl.BlockSpec((1, hidden), full),
            pl.BlockSpec((hidden, hidden), full),
            pl.BlockSpec((1, hidden), full),
            pl.BlockSpec((hidden, d_out), full),
            pl.BlockSpec((1, d_out), full),
        ],
        out_specs=pl.BlockSpec((row_tile, d_out), lambda i: (i, 0)),
        compiler_params=pltpu.CompilerParams(dimension_semantics=("parallel",)),
    )(x, w1, b1, w2, b2, w3, b3)


# --------------------------------------------------------------------- module wrapper
def init_params(key, z_dim, hidden_size, data_dim, n_classes):
    """Synthetic parameters in PyTorch layout (nn.Linear stores (out, in))."""
    ks = jax.random.split(key, 9)
    s = 0.1
    return {
        "emb_table": s * jax.random.normal(ks[0], (n_classes, z_dim), jnp.float32),
        "emb_w": s * jax.random.normal(ks[1], (z_dim, z_dim), jnp.float32),
        "emb_b": s * jax.random.normal(ks[2], (z_dim,), jnp.float32),
        "w1": s * jax.random.normal(ks[3], (hidden_size, z_dim + n_classes - 1), jnp.float32),
        "b1": s * jax.random.normal(ks[4], (hidden_size,), jnp.float32),
        "w2": s * jax.random.normal(ks[5], (hidden_size, hidden_size), jnp.float32),
        "b2": s * jax.random.normal(ks[6], (hidden_size,), jnp.float32),
        "w3": s * jax.random.normal(ks[7], (data_dim, hidden_size), jnp.float32),
        "b3": s * jax.random.normal(ks[8], (data_dim,), jnp.float32),
    }


def prepare_params(params):
    """One-time prep (outside jit): fold Embedding∘Linear, transpose weights, cast to bf16."""
    # label_embedding: Linear(Embedding(labels)) == (emb_table @ emb_w.T + emb_b)[labels]
    emb_eff = params["emb_table"] @ params["emb_w"].T + params["emb_b"]   # (n_classes, z_dim)
    return {
        "emb_eff": jnp.asarray(emb_eff, jnp.float32),
        "w1": jnp.asarray(params["w1"].T, jnp.bfloat16),        # (x_feat+1, hidden)
        "b1": jnp.asarray(params["b1"].reshape(1, -1), jnp.float32),
        "w2": jnp.asarray(params["w2"].T, jnp.bfloat16),        # (hidden, hidden)
        "b2": jnp.asarray(params["b2"].reshape(1, -1), jnp.float32),
        "w3": jnp.asarray(params["w3"].T, jnp.bfloat16),        # (hidden, data_dim)
        "b3": jnp.asarray(params["b3"].reshape(1, -1), jnp.float32),
    }


@jax.jit
def conditional_generator_forward(x, labels, prep):
    # Per-call glue: gather the folded embedding row, view(-1, 1), and concatenate it onto x
    # so layer 1 is a single matmul inside the kernel (no width-1 block, no rank-1 update).
    lab_col = jnp.take(prep["emb_eff"], labels, axis=0).reshape(-1, 1)   # (B*z_dim, 1)
    inp = jnp.concatenate([x.astype(jnp.float32), lab_col], axis=1)      # (B*z_dim, feat+1)
    return mlp_pallas(inp, prep["w1"], prep["b1"], prep["w2"], prep["b2"],
                      prep["w3"], prep["b3"])


def reference_forward(x, labels, params):
    emb = jnp.take(params["emb_table"], labels, axis=0) @ params["emb_w"].T + params["emb_b"]
    inp = jnp.concatenate([x, emb.reshape(-1, 1)], axis=1)
    h = _elu(inp @ params["w1"].T + params["b1"], 0.2)
    h = _elu(h @ params["w2"].T + params["b2"], 0.2)
    return h @ params["w3"].T + params["b3"]


# ------------------------------------------------------------------------------- main
if __name__ == "__main__":
    # Shapes consistent with the forward pass:
    #   labels: (B,) ints in [0, n_classes); after embed+view(-1, 1) rows = B * z_dim,
    #   so x has B*z_dim rows and (z_dim + n_classes - 2) features.
    # hidden/data_dim = 128 so matmul lanes and output stores are lane-dense.
    z_dim, hidden_size, data_dim, n_classes = 4, 128, 128, 3
    x_feat = z_dim + n_classes - 2                 # 5

    key = jax.random.PRNGKey(0)
    kp, kx1, kl1, kx2, kl2 = jax.random.split(key, 5)
    params = init_params(kp, z_dim, hidden_size, data_dim, n_classes)
    prep = prepare_params(params)                  # one-time: fold emb, transpose, bf16 weights

    # Case 1: tiny batch -> single full-dim row tile.
    batch = 2
    n_rows = batch * z_dim                         # 8
    x = jax.random.normal(kx1, (n_rows, x_feat), jnp.float32)
    labels = jax.random.randint(kl1, (batch,), 0, n_classes, jnp.int32)
    out = jax.block_until_ready(conditional_generator_forward(x, labels, prep))
    ref = reference_forward(x, labels, params)
    assert out.shape == (n_rows, data_dim), out.shape
    assert jnp.allclose(out, ref, rtol=2.5e-2, atol=2.5e-2), "mismatch vs reference (tiny)"

    # Case 2: non-tile-aligned rows -> multi-step grid with a masked edge tile (no pad/slice).
    batch = 75
    n_rows = batch * z_dim                         # 300 rows -> 3 steps of 128
    x = jax.random.normal(kx2, (n_rows, x_feat), jnp.float32)
    labels = jax.random.randint(kl2, (batch,), 0, n_classes, jnp.int32)
    out = jax.block_until_ready(conditional_generator_forward(x, labels, prep))
    ref = reference_forward(x, labels, params)
    assert out.shape == (n_rows, data_dim), out.shape
    assert jnp.allclose(out, ref, rtol=2.5e-2, atol=2.5e-2), "mismatch vs reference (tiled)"

    print("KERNEL_OK")
</pallas_src>

<mosaic_0001>
module attributes {stable_mosaic.version = 11 : i64} {
  func.func @_mlp_kernel(%arg0: i32, %arg1: memref<8x6xf32, #tpu.memory_space<vmem>>, %arg2: memref<6x128xbf16, #tpu.memory_space<vmem>>, %arg3: memref<1x128xf32, #tpu.memory_space<vmem>>, %arg4: memref<128x128xbf16, #tpu.memory_space<vmem>>, %arg5: memref<1x128xf32, #tpu.memory_space<vmem>>, %arg6: memref<128x128xbf16, #tpu.memory_space<vmem>>, %arg7: memref<1x128xf32, #tpu.memory_space<vmem>>, %arg8: memref<8x128xf32, #tpu.memory_space<vmem>>) attributes {dimension_semantics = [#tpu.dimension_semantics<parallel>], iteration_bounds = array<i64: 1>, scalar_prefetch = 0 : i64, scratch_operands = 0 : i64, tpu.core_type = #tpu.core_type<tc>, window_params = [{transform_indices = @transform_0, window_bounds = array<i64: 8, 6>}, {pipeline_mode = #tpu.pipeline_mode<synchronous>, transform_indices = @transform_1, window_bounds = array<i64: 6, 128>}, {pipeline_mode = #tpu.pipeline_mode<synchronous>, transform_indices = @transform_2, window_bounds = array<i64: 1, 128>}, {pipeline_mode = #tpu.pipeline_mode<synchronous>, transform_indices = @transform_3, window_bounds = array<i64: 128, 128>}, {pipeline_mode = #tpu.pipeline_mode<synchronous>, transform_indices = @transform_4, window_bounds = array<i64: 1, 128>}, {pipeline_mode = #tpu.pipeline_mode<synchronous>, transform_indices = @transform_5, window_bounds = array<i64: 128, 128>}, {pipeline_mode = #tpu.pipeline_mode<synchronous>, transform_indices = @transform_6, window_bounds = array<i64: 1, 128>}, {transform_indices = @transform_7, window_bounds = array<i64: 8, 128>}]} {
    %c0 = arith.constant 0 : index
    %c0_0 = arith.constant 0 : index
    %0 = vector.load %arg1[%c0, %c0_0] : memref<8x6xf32, #tpu.memory_space<vmem>>, vector<8x6xf32>
    %1 = arith.truncf %0 : vector<8x6xf32> to vector<8x6xbf16>
    %c0_1 = arith.constant 0 : index
    %c0_2 = arith.constant 0 : index
    %2 = vector.load %arg2[%c0_1, %c0_2] : memref<6x128xbf16, #tpu.memory_space<vmem>>, vector<6x128xbf16>
    %cst = arith.constant dense<0.000000e+00> : vector<8x128xf32>
    %3 = tpu.matmul %1, %2, %cst {dimension_numbers = #tpu.dot_dimension_numbers<[1], [0], [0], [1], [0, 0, 1, 1], [], []>} : vector<8x6xbf16>, vector<6x128xbf16>, vector<8x128xf32> -> vector<8x128xf32>
    %c0_3 = arith.constant 0 : index
    %c0_4 = arith.constant 0 : index
    %4 = vector.load %arg3[%c0_3, %c0_4] : memref<1x128xf32, #tpu.memory_space<vmem>>, vector<1x128xf32>
    %5 = vector.broadcast %4 : vector<1x128xf32> to vector<8x128xf32>
    %6 = arith.addf %3, %5 : vector<8x128xf32>
    %cst_5 = arith.constant 0.000000e+00 : f32
    %7 = vector.broadcast %cst_5 : f32 to vector<8x128xf32>
    %8 = arith.cmpf ogt, %6, %7 : vector<8x128xf32>
    %9 = math.exp %6 : vector<8x128xf32>
    %cst_6 = arith.constant 1.000000e+00 : f32
    %10 = vector.broadcast %cst_6 : f32 to vector<8x128xf32>
    %11 = arith.subf %9, %10 : vector<8x128xf32>
    %cst_7 = arith.constant 2.000000e-01 : f32
    %12 = vector.broadcast %cst_7 : f32 to vector<8x128xf32>
    %13 = arith.mulf %12, %11 : vector<8x128xf32>
    %14 = arith.select %8, %6, %13 : vector<8x128xi1>, vector<8x128xf32>
    %15 = arith.truncf %14 : vector<8x128xf32> to vector<8x128xbf16>
    %c0_8 = arith.constant 0 : index
    %c0_9 = arith.constant 0 : index
    %16 = vector.load %arg4[%c0_8, %c0_9] : memref<128x128xbf16, #tpu.memory_space<vmem>>, vector<128x128xbf16>
    %cst_10 = arith.constant dense<0.000000e+00> : vector<8x128xf32>
    %17 = tpu.matmul %15, %16, %cst_10 {dimension_numbers = #tpu.dot_dimension_numbers<[1], [0], [0], [1], [0, 0, 1, 1], [], []>} : vector<8x128xbf16>, vector<128x128xbf16>, vector<8x128xf32> -> vector<8x128xf32>
    %c0_11 = arith.constant 0 : index
    %c0_12 = arith.constant 0 : index
    %18 = vector.load %arg5[%c0_11, %c0_12] : memref<1x128xf32, #tpu.memory_space<vmem>>, vector<1x128xf32>
    %19 = vector.broadcast %18 : vector<1x128xf32> to vector<8x128xf32>
    %20 = arith.addf %17, %19 : vector<8x128xf32>
    %cst_13 = arith.constant 0.000000e+00 : f32
    %21 = vector.broadcast %cst_13 : f32 to vector<8x128xf32>
    %22 = arith.cmpf ogt, %20, %21 : vector<8x128xf32>
    %23 = math.exp %20 : vector<8x128xf32>
    %cst_14 = arith.constant 1.000000e+00 : f32
    %24 = vector.broadcast %cst_14 : f32 to vector<8x128xf32>
    %25 = arith.subf %23, %24 : vector<8x128xf32>
    %cst_15 = arith.constant 2.000000e-01 : f32
    %26 = vector.broadcast %cst_15 : f32 to vector<8x128xf32>
    %27 = arith.mulf %26, %25 : vector<8x128xf32>
    %28 = arith.select %22, %20, %27 : vector<8x128xi1>, vector<8x128xf32>
    %29 = arith.truncf %28 : vector<8x128xf32> to vector<8x128xbf16>
    %c0_16 = arith.constant 0 : index
    %c0_17 = arith.constant 0 : index
    %30 = vector.load %arg6[%c0_16, %c0_17] : memref<128x128xbf16, #tpu.memory_space<vmem>>, vector<128x128xbf16>
    %cst_18 = arith.constant dense<0.000000e+00> : vector<8x128xf32>
    %31 = tpu.matmul %29, %30, %cst_18 {dimension_numbers = #tpu.dot_dimension_numbers<[1], [0], [0], [1], [0, 0, 1, 1], [], []>} : vector<8x128xbf16>, vector<128x128xbf16>, vector<8x128xf32> -> vector<8x128xf32>
    %c0_19 = arith.constant 0 : index
    %c0_20 = arith.constant 0 : index
    %32 = vector.load %arg7[%c0_19, %c0_20] : memref<1x128xf32, #tpu.memory_space<vmem>>, vector<1x128xf32>
    %33 = vector.broadcast %32 : vector<1x128xf32> to vector<8x128xf32>
    %34 = arith.addf %31, %33 : vector<8x128xf32>
    %c0_21 = arith.constant 0 : index
    %c0_22 = arith.constant 0 : index
    %35 = vector.load %arg8[%c0_21, %c0_22] : memref<8x128xf32, #tpu.memory_space<vmem>>, vector<8x128xf32>
    tpu.vector_store %arg8[%c0_21, %c0_22], %34 {strides = array<i32>} : memref<8x128xf32, #tpu.memory_space<vmem>>, vector<8x128xf32>,
    return
  }
  func.func @transform_0(%arg0: i32) -> (i32, i32) {
    %c0_i32 = arith.constant 0 : i32
    %c0_i32_0 = arith.constant 0 : i32
    return %arg0, %c0_i32 : i32, i32
  }
  func.func @transform_1(%arg0: i32) -> (i32, i32) {
    %c0_i32 = arith.constant 0 : i32
    %c0_i32_0 = arith.constant 0 : i32
    %c0_i32_1 = arith.constant 0 : i32
    return %c0_i32, %c0_i32_0 : i32, i32
  }
  func.func @transform_2(%arg0: i32) -> (i32, i32) {
    %c0_i32 = arith.constant 0 : i32
    %c0_i32_0 = arith.constant 0 : i32
    %c0_i32_1 = arith.constant 0 : i32
    return %c0_i32, %c0_i32_0 : i32, i32
  }
  func.func @transform_3(%arg0: i32) -> (i32, i32) {
    %c0_i32 = arith.constant 0 : i32
    %c0_i32_0 = arith.constant 0 : i32
    %c0_i32_1 = arith.constant 0 : i32
    return %c0_i32, %c0_i32_0 : i32, i32
  }
  func.func @transform_4(%arg0: i32) -> (i32, i32) {
    %c0_i32 = arith.constant 0 : i32
    %c0_i32_0 = arith.constant 0 : i32
    %c0_i32_1 = arith.constant 0 : i32
    return %c0_i32, %c0_i32_0 : i32, i32
  }
  func.func @transform_5(%arg0: i32) -> (i32, i32) {
    %c0_i32 = arith.constant 0 : i32
    %c0_i32_0 = arith.constant 0 : i32
    %c0_i32_1 = arith.constant 0 : i32
    return %c0_i32, %c0_i32_0 : i32, i32
  }
  func.func @transform_6(%arg0: i32) -> (i32, i32) {
    %c0_i32 = arith.constant 0 : i32
    %c0_i32_0 = arith.constant 0 : i32
    %c0_i32_1 = arith.constant 0 : i32
    return %c0_i32, %c0_i32_0 : i32, i32
  }
  func.func @transform_7(%arg0: i32) -> (i32, i32) {
    %c0_i32 = arith.constant 0 : i32
    %c0_i32_0 = arith.constant 0 : i32
    return %arg0, %c0_i32 : i32, i32
  }
}

</mosaic_0001>

<bundles_post_ra>
// kernel: conditional_generator_forward.1
= control target key start
LH: loop header
LB: loop body
LE: loop exit
PB: predicated region body
PF: predicated region fallthrough
CT: control target
= control target key end

     0   :  { %12 = vsyncpa [#allocation3], 0  ;;  %s525_s0 = inlined_call_operand.vmem [shape: f32[8,6], index: 0, kind: input, shape index: {}]   ;;  %s526_s1 = inlined_call_operand.vmem [shape: bf16[6,128], index: 1, kind: input, shape index: {}]   ;;  %s527_s2 = inlined_call_operand.vmem [shape: f32[1,128], index: 2, kind: input, shape index: {}]   ;;  %s528_s3 = inlined_call_operand.hbm [shape: bf16[128,128], index: 3, kind: input, shape index: {}]   ;;  %s529_s4 = inlined_call_operand.vmem [shape: f32[1,128], index: 4, kind: input, shape index: {}]   ;;  %s530_s5 = inlined_call_operand.hbm [shape: bf16[128,128], index: 5, kind: input, shape index: {}]   ;;  %s531_s6 = inlined_call_operand.vmem [shape: f32[1,128], index: 6, kind: input, shape index: {}]   ;;  %s532_s7 = inlined_call_operand.hbm [shape: f32[8,128], index: 7, kind: output, shape index: {}]  }
   0x1   :  { %13 = vsyncpa [#allocation6], 0 }
   0x2   :  { %14 = vsyncpa [#allocation4], 0  ;;  %s25_s26 = sshll.u32 %s528_s3, 4  ;;  %s456_s27 = smov [#allocation2]   ;;  %s26_s26 = int_to_ptr.hbm [resolvable:$true] %s25_s26 }
   0x3   :  { %s27_s28 = sshll.u32 %s456_s27, 4  ;;  %s40_s8 = sshll.u32 %s530_s5, 4  ;;  %s28_s28 = int_to_ptr.vmem [resolvable:$true] %s27_s28  ;;  %s41_s8 = int_to_ptr.hbm [resolvable:$true] %s40_s8 }
   0x4   :  { %s457_s9 = smov 64   ;;  %s458_s10 = smov 4  }
   0x5   :  { %33 = dma.hbm_to_vmem [thread:$0]  %s26_s26, 1024, %s28_s28, [#allocation3], %s457_s9, %s457_s9, %s458_s10  }
   0x6   :  { %s459_s11 = smov [#allocation5]  }
   0x7   :  { %s42_s12 = sshll.u32 %s459_s11, 4  ;;  %s43_s12 = int_to_ptr.vmem [resolvable:$true] %s42_s12 }
   0x8   :  { %48 = dma.hbm_to_vmem [thread:$0]  %s41_s8, 1024, %s43_s12, [#allocation6], %s457_s9, %s457_s9, %s458_s10  }
   0x9   :  { %450 = dma.done.wait [#allocation3], 1024  }
   0xa   :  { %451 = vsyncadd [#allocation3], 4294966272 }
   0xb   :  { %452 = dma.done.wait [#allocation6], 1024  }
   0xc   :  { %453 = vsyncadd [#allocation6], 4294966272  ;;  %vm71_vm0 = vcmask 1042432   ;;  %v62_v0 = vld [vmem:[%s526_s1] sm:$0x7]  ;;  %v357_v2 = vld [vmem:[#allocation2 + $0x38] sm:$0xff] }
   0xd   :  { %v60_v1 = vld [vmem:[%s525_s0] sm:$0xff]  ;;  %v73_v3 = vsel %vm71_vm0, %v62_v0, 0  ;;  %vm67_vm1 = vcmask 48128   ;;  %163 = vmatpush.bf16.msra.mxu1 %v357_v2  ;;  %v356_v5 = vld [vmem:[#allocation2 + $0x30] sm:$0xff]  ;;  %v355_v6 = vld [vmem:[#allocation2 + $0x28] sm:$0xff]  ;;  %s460_s18 = smov [#allocation7]  }
   0xe   :  { %v61_v4 = vpack.c.bf16 %v60_v1, %v60_v1  ;;  %82 = vmatpush.bf16.msra.mxu0 %v73_v3  ;;  %v354_v7 = vld [vmem:[#allocation2 + $0x20] sm:$0xff]  ;;  %v353_v8 = vld [vmem:[#allocation2 + $0x18] sm:$0xff]  ;;  %v352_v9 = vld [vmem:[#allocation2 + $0x10] sm:$0xff]  ;;  %s270_s19 = sshll.u32 %s460_s18, 4  ;;  %s272_s21 = sshll.u32 %s532_s7, 4  ;;  %s271_s19 = int_to_ptr.vmem [resolvable:$true] %s270_s19  ;;  %s273_s21 = int_to_ptr.hbm [resolvable:$true] %s272_s21 }
   0xf   :  { %v351_v10 = vld [vmem:[#allocation2 + $0x8] sm:$0xff]  ;;  %v350_v11 = vld [vmem:[#allocation2] sm:$0xff]  ;;  %v365_v12 = vld [vmem:[#allocation5 + $0x38] sm:$0xff] }
  0x10   :  { %251 = vmatpush.bf16.msra.mxu2 %v365_v12  ;;  %v364_v13 = vld [vmem:[#allocation5 + $0x30] sm:$0xff]  ;;  %v363_v14 = vld [vmem:[#allocation5 + $0x28] sm:$0xff]  ;;  %v371_v15 = vld [vmem:[%s527_s2] ss:$0 sm:$0xff] }
  0x11   :  { %283 = vmatmul.msk.bf16.vlgmr.msra.gmra.mxu0 %vm67_vm1, %v61_v4  ;;  %164 = vmatpush.bf16.msra.mxu1 %v356_v5  ;;  %v362_v25 = vld [vmem:[#allocation5 + $0x20] sm:$0xff]  ;;  %v361_v26 = vld [vmem:[#allocation5 + $0x18] sm:$0xff]  ;;  %v360_v27 = vld [vmem:[#allocation5 + $0x10] sm:$0xff] }
  0x12   :  { %v359_v28 = vld [vmem:[#allocation5 + $0x8] sm:$0xff]  ;;  %v358_v29 = vld [vmem:[#allocation5] sm:$0xff] }
  0x13   :  { %v372_v30 = vld [vmem:[%s529_s4] ss:$0 sm:$0xff] }
  0x14   :  { %252 = vmatpush.bf16.msra.mxu2 %v364_v13  ;;  %v373_v40 = vld [vmem:[%s531_s6] ss:$0 sm:$0xff] }
  0x15   :  { %165 = vmatpush.bf16.msra.mxu1 %v355_v6 }
  0x18   :  { %253 = vmatpush.bf16.msra.mxu2 %v363_v14 }
  0x19   :  { %166 = vmatpush.bf16.msra.mxu1 %v354_v7 }
  0x1c   :  { %254 = vmatpush.bf16.msra.mxu2 %v362_v25 }
  0x1d   :  { %167 = vmatpush.bf16.msra.mxu1 %v353_v8 }
  0x20   :  { %255 = vmatpush.bf16.msra.mxu2 %v361_v26 }
  0x21   :  { %168 = vmatpush.bf16.msra.mxu1 %v352_v9 }
  0x24   :  { %256 = vmatpush.bf16.msra.mxu2 %v360_v27 }
  0x25   :  { %169 = vmatpush.bf16.msra.mxu1 %v351_v10 }
  0x28   :  { %257 = vmatpush.bf16.msra.mxu2 %v359_v28 }
  0x29   :  { %170 = vmatpush.bf16.msra.mxu1 %v350_v11 }
  0x2c   :  { %258 = vmatpush.bf16.msra.mxu2 %v358_v29 }
  0x8e   :  { %v84_v16 = vpop.f32.mrf.mxu0 }
  0x8f   :  { %v85_v17 = vadd.f32 %v371_v15, %v84_v16 }
  0x91   :  { %v89_v18 = vmul.f32 1.442695, %v85_v17  ;;  %vm88_vm2 = vcmp.gt.f32.partialorder %v85_v17, 0.0 }
  0x93   :  { %374 = vpow2.f32 %v89_v18 }
  0x96   :  { %v86_v19 = vpop.f32.mrf.mxu0 }
  0x99   :  { %v375_v20 = vpop.eup %374 }
  0x9a   :  { %v284_v21 = vadd.f32 -1.0, %v375_v20 }
  0x9c   :  { %v92_v22 = vmul.f32 0.2, %v284_v21 }
  0x9e   :  { %v93_v23 = vsel %vm88_vm2, %v85_v17, %v92_v22 }
  0x9f   :  { %v94_v24 = vpack.c.bf16 %v93_v23, %v93_v23 }
  0xa1   :  { %171 = vmatmul.bf16.vlgmr.msra.gmra.mxu1 %v94_v24 }
 0x11e   :  { %v172_v31 = vpop.f32.mrf.mxu1 }
 0x11f   :  { %v173_v32 = vadd.f32 %v372_v30, %v172_v31 }
 0x121   :  { %v177_v33 = vmul.f32 1.442695, %v173_v32  ;;  %vm176_vm3 = vcmp.gt.f32.partialorder %v173_v32, 0.0 }
 0x123   :  { %376 = vpow2.f32 %v177_v33 }
 0x126   :  { %v174_v34 = vpop.f32.mrf.mxu1 }
 0x129   :  { %v377_v35 = vpop.eup %376 }
 0x12a   :  { %v317_v36 = vadd.f32 -1.0, %v377_v35 }
 0x12c   :  { %v180_v37 = vmul.f32 0.2, %v317_v36 }
 0x12e   :  { %v181_v38 = vsel %vm176_vm3, %v173_v32, %v180_v37 }
 0x12f   :  { %v182_v39 = vpack.c.bf16 %v181_v38, %v181_v38 }
 0x131   :  { %259 = vmatmul.bf16.vlgmr.msra.gmra.mxu2 %v182_v39 }
 0x1b4   :  { %v260_v41 = vpop.f32.mrf.mxu2 }
 0x1b5   :  { %v261_v42 = vadd.f32 %v373_v40, %v260_v41 }
 0x1b7   :  { %264 = vst [vmem:[#allocation7] sm:$0xff] %v261_v42 }
 0x1b8   :  { %275 = dma.vmem_to_hbm [thread:$0]  %s271_s19, 128, %s273_s21, [#allocation4]  }
 0x1bc   :  { %v262_v43 = vpop.f32.mrf.mxu2 }
 0x1bd   :  { %454 = dma.done.wait [#allocation4], 128  }
 0x1be   :  { %455 = vsyncadd [#allocation4], 4294967168 }
 0x1bf   :  { %280 = vsyncpa [#allocation3], 1 }
 0x1c0   :  { %281 = vsyncpa [#allocation6], 1 }
 0x1c1   :  { %282 = vsyncpa [#allocation4], 1 }

</bundles_post_ra>
